<compile_context>
chip_gen: v7x
topology: tpu7x:2x2x1
jax: 0.10.0
libtpu: 0.0.40
codegen_flags: <defaults>
</compile_context>

<pallas_src>
import math
from functools import partial
from typing import NamedTuple

import jax
import jax.numpy as jnp
from jax import lax
from jax.experimental import pallas as pl
from jax.experimental.pallas import tpu as pltpu


_VMEM_LIMIT_BYTES = 48 * 1024 * 1024  # > scoped defaults, < v7x 64 MiB physical


def _round_up(x, m):
    return ((x + m - 1) // m) * m


# ---------------------------------------------------------------------------
# Tiled linear (y = x @ w + b) with f32 accumulator, bias fused in epilogue
# ---------------------------------------------------------------------------
def _linear_kernel(x_ref, w_ref, b_ref, o_ref, acc_ref):
    @pl.when(pl.program_id(2) == 0)
    def _():
        acc_ref[...] = jnp.zeros_like(acc_ref)

    acc_ref[...] += jnp.dot(x_ref[...], w_ref[...],
                            preferred_element_type=jnp.float32)

    @pl.when(pl.program_id(2) == pl.num_programs(2) - 1)
    def _():
        o_ref[...] = (acc_ref[...] + b_ref[...]).astype(o_ref.dtype)


class LinearParams(NamedTuple):
    wp: jax.Array      # [Kp, Np] bf16, pre-padded / pre-cast
    bp: jax.Array      # [1, Np] f32, pre-padded
    din: int
    dout: int
    tk: int
    tn: int


def prep_linear_params(w, b):
    """Pad + cast weights once (at init) instead of per forward call."""
    din, dout = w.shape
    tk = min(512, _round_up(din, 128))
    tn = min(1024, _round_up(dout, 128))
    kp, np_ = _round_up(din, tk), _round_up(dout, tn)
    wp = jnp.pad(w, ((0, kp - din), (0, np_ - dout))).astype(jnp.bfloat16)
    bp = jnp.pad(b, (0, np_ - dout)).astype(jnp.float32).reshape(1, np_)
    return LinearParams(wp, bp, din, dout, tk, tn)


def pallas_linear(x2d, p: LinearParams, out_dtype=jnp.float32):
    """x2d: [M, Din] (any float dtype); weights pre-prepared in `p`."""
    M, din = x2d.shape
    assert din == p.din
    tm = min(512, _round_up(M, 8))
    Mp = _round_up(M, tm)
    Kp, Np = p.wp.shape
    xp = jnp.pad(x2d, ((0, Mp - M), (0, Kp - din))).astype(jnp.bfloat16)

    out = pl.pallas_call(
        _linear_kernel,
        out_shape=jax.ShapeDtypeStruct((Mp, Np), out_dtype),
        grid=(Mp // tm, Np // p.tn, Kp // p.tk),
        in_specs=[
            pl.BlockSpec((tm, p.tk), lambda i, j, k: (i, k)),
            pl.BlockSpec((p.tk, p.tn), lambda i, j, k: (k, j)),
            pl.BlockSpec((1, p.tn), lambda i, j, k: (0, j)),
        ],
        out_specs=pl.BlockSpec((tm, p.tn), lambda i, j, k: (i, j)),
        scratch_shapes=[pltpu.VMEM((tm, p.tn), jnp.float32)],
        compiler_params=pltpu.CompilerParams(
            dimension_semantics=("parallel", "parallel", "arbitrary"),
            vmem_limit_bytes=_VMEM_LIMIT_BYTES),
    )(xp, p.wp, p.bp)
    return out[:M, :p.dout]


# ---------------------------------------------------------------------------
# Flash-style multi-head attention (all heads per grid step, online softmax)
# ---------------------------------------------------------------------------
def _attn_kernel(*refs, h, d_k, tkv, sk_real, has_mask, needs_col_mask):
    if has_mask:
        q_ref, k_ref, v_ref, mask_ref, o_ref, m_sc, l_sc, acc_sc = refs
    else:
        q_ref, k_ref, v_ref, o_ref, m_sc, l_sc, acc_sc = refs
        mask_ref = None

    kv = pl.program_id(2)

    @pl.when(kv == 0)
    def _():
        m_sc[...] = jnp.full_like(m_sc, -1e30)
        l_sc[...] = jnp.zeros_like(l_sc)
        acc_sc[...] = jnp.zeros_like(acc_sc)

    # q is already scaled by 1/sqrt(d_k): the scale was folded into W_q / b_q.
    q = q_ref[0]        # [tq, Dm] bf16
    kmat = k_ref[0]     # [tkv, Dm] bf16
    vmat = v_ref[0]     # [tkv, Dm] bf16

    # One additive score bias per kv step (mask + kv-padding), shared by all heads.
    bias = None
    if has_mask:
        bias = jnp.where(mask_ref[0] == 0, -1e9, 0.0).astype(jnp.float32)  # [tq, tkv]
    if needs_col_mask:
        col = kv * tkv + lax.broadcasted_iota(jnp.int32, (1, tkv), 1)
        pad_bias = jnp.where(col >= sk_real, -1e30, 0.0).astype(jnp.float32)  # [1, tkv]
        bias = pad_bias if bias is None else bias + pad_bias

    # TODO(synk): for large h with d_k % 128 == 0, switch to lax.fori_loop with
    # pl.ds(pl.multiple_of(head*d_k, 128), d_k) to bound live ranges; for d_k<128
    # a head-major layout would fill the 256-deep MXU better.
    for head in range(h):
        sl = slice(head * d_k, (head + 1) * d_k)
        hcol = slice(head, head + 1)
        # Contract over d_k directly (transposed-RHS form, native on the MXU).
        s = lax.dot_general(q[:, sl], kmat[:, sl],
                            dimension_numbers=(((1,), (1,)), ((), ())),
                            preferred_element_type=jnp.float32)        # [tq, tkv]
        if bias is not None:
            s = s + bias

        m_prev = m_sc[:, hcol]                                         # [tq, 1]
        m_new = jnp.maximum(m_prev, jnp.max(s, axis=-1, keepdims=True))
        alpha = jnp.exp(m_prev - m_new)                                # [tq, 1]
        p = jnp.exp(s - m_new)                                         # [tq, tkv] f32

        l_sc[:, hcol] = alpha * l_sc[:, hcol] + jnp.sum(p, axis=-1, keepdims=True)
        acc_sc[:, sl] = alpha * acc_sc[:, sl] + jnp.dot(
            p.astype(vmat.dtype), vmat[:, sl],
            preferred_element_type=jnp.float32)
        m_sc[:, hcol] = m_new

    @pl.when(kv == pl.num_programs(2) - 1)
    def _():
        inv_l = pl.reciprocal(l_sc[...], approx=True)                  # [tq, 128]
        for head in range(h):
            sl = slice(head * d_k, (head + 1) * d_k)
            acc_sc[:, sl] = acc_sc[:, sl] * inv_l[:, head:head + 1]
        o_ref[0] = acc_sc[...].astype(o_ref.dtype)                     # lane-dense [tq, Dm]


def _attn_scratch(tq, d_model):
    return [
        pltpu.VMEM((tq, 128), jnp.float32),      # running max, one lane column per head
        pltpu.VMEM((tq, 128), jnp.float32),      # running denom, one lane column per head
        pltpu.VMEM((tq, d_model), jnp.float32),  # running numerator (lane-dense)
    ]


_ATTN_COMPILER_PARAMS = pltpu.CompilerParams(
    dimension_semantics=("parallel", "parallel", "arbitrary"),
    vmem_limit_bytes=_VMEM_LIMIT_BYTES)


def pallas_attention(q, k, v, mask_i8, h, d_k):
    """Separate q/k/v path.  q: [B,Sq,Dm], k/v: [B,Sk,Dm] (bf16, q pre-scaled)."""
    B, Sq, Dm = q.shape
    Sk = k.shape[1]
    tq = min(256, _round_up(Sq, 8))
    tkv = min(512, _round_up(Sk, 128))
    Sq_p, Sk_p = _round_up(Sq, tq), _round_up(Sk, tkv)

    qp = jnp.pad(q, ((0, 0), (0, Sq_p - Sq), (0, 0)))
    kp = jnp.pad(k, ((0, 0), (0, Sk_p - Sk), (0, 0)))
    vp = jnp.pad(v, ((0, 0), (0, Sk_p - Sk), (0, 0)))

    has_mask = mask_i8 is not None
    needs_col_mask = Sk_p != Sk

    in_specs = [
        pl.BlockSpec((1, tq, Dm), lambda b, qi, kv: (b, qi, 0)),
        pl.BlockSpec((1, tkv, Dm), lambda b, qi, kv: (b, kv, 0)),
        pl.BlockSpec((1, tkv, Dm), lambda b, qi, kv: (b, kv, 0)),
    ]
    args = [qp, kp, vp]
    if has_mask:
        mp = jnp.pad(mask_i8, ((0, 0), (0, Sq_p - Sq), (0, Sk_p - Sk)))
        in_specs.append(pl.BlockSpec((1, tq, tkv), lambda b, qi, kv: (b, qi, kv)))
        args.append(mp)

    out = pl.pallas_call(
        partial(_attn_kernel, h=h, d_k=d_k, tkv=tkv, sk_real=Sk,
                has_mask=has_mask, needs_col_mask=needs_col_mask),
        out_shape=jax.ShapeDtypeStruct((B, Sq_p, Dm), q.dtype),
        grid=(B, Sq_p // tq, Sk_p // tkv),
        in_specs=in_specs,
        out_specs=pl.BlockSpec((1, tq, Dm), lambda b, qi, kv: (b, qi, 0)),
        scratch_shapes=_attn_scratch(tq, Dm),
        compiler_params=_ATTN_COMPILER_PARAMS,
    )(*args)
    return out[:, :Sq, :]


def pallas_attention_fused(qkv, mask_i8, h, d_k, d_model):
    """Self-attention consuming the fused [B, S, 3*Dm] projection directly.

    Requires d_model % 128 == 0 so the q/k/v views are 128-aligned blocks of the
    same HBM buffer (no wrapper slices / extra HBM copies)."""
    B, S, _ = qkv.shape
    Dm = d_model
    t = min(256, _round_up(S, 128))          # same tile for q and kv rows
    S_pad = _round_up(S, t)
    qkv_p = jnp.pad(qkv, ((0, 0), (0, S_pad - S), (0, 0)))

    has_mask = mask_i8 is not None
    needs_col_mask = S_pad != S

    in_specs = [
        pl.BlockSpec((1, t, Dm), lambda b, qi, kv: (b, qi, 0)),   # q view
        pl.BlockSpec((1, t, Dm), lambda b, qi, kv: (b, kv, 1)),   # k view
        pl.BlockSpec((1, t, Dm), lambda b, qi, kv: (b, kv, 2)),   # v view
    ]
    args = [qkv_p, qkv_p, qkv_p]
    if has_mask:
        mp = jnp.pad(mask_i8, ((0, 0), (0, S_pad - S), (0, S_pad - S)))
        in_specs.append(pl.BlockSpec((1, t, t), lambda b, qi, kv: (b, qi, kv)))
        args.append(mp)

    out = pl.pallas_call(
        partial(_attn_kernel, h=h, d_k=d_k, tkv=t, sk_real=S,
                has_mask=has_mask, needs_col_mask=needs_col_mask),
        out_shape=jax.ShapeDtypeStruct((B, S_pad, Dm), qkv.dtype),
        grid=(B, S_pad // t, S_pad // t),
        in_specs=in_specs,
        out_specs=pl.BlockSpec((1, t, Dm), lambda b, qi, kv: (b, qi, 0)),
        scratch_shapes=_attn_scratch(t, Dm),
        compiler_params=_ATTN_COMPILER_PARAMS,
    )(*args)
    return out[:, :S, :]


# ---------------------------------------------------------------------------
# Module wrapper
# ---------------------------------------------------------------------------
class MultiHeadedAttentionPallas:
    def __init__(self, h, d_model, key):
        assert d_model % h == 0
        assert h <= 128, "m/l scratch stores one lane column per head"
        self.h = h
        self.d_k = d_model // h
        self.d_model = d_model
        bound = 1.0 / math.sqrt(d_model)
        keys = jax.random.split(key, 8)
        # Reference parameters (f32, unscaled, stored [Din, Dout]).
        self.weights, self.biases = [], []
        for i in range(4):
            w = jax.random.uniform(keys[2 * i], (d_model, d_model),
                                   jnp.float32, -bound, bound)
            b = jax.random.uniform(keys[2 * i + 1], (d_model,),
                                   jnp.float32, -bound, bound)
            self.weights.append(w)
            self.biases.append(b)

        # Kernel parameters: fold 1/sqrt(d_k) into the Q projection, pre-pad and
        # pre-cast to bf16 once (no per-call weight pad/convert traffic).
        scale = 1.0 / math.sqrt(self.d_k)
        kernel_ws = [self.weights[0] * scale, self.weights[1],
                     self.weights[2], self.weights[3]]
        kernel_bs = [self.biases[0] * scale, self.biases[1],
                     self.biases[2], self.biases[3]]
        self.lin_params = [prep_linear_params(w, b)
                           for w, b in zip(kernel_ws, kernel_bs)]
        self.qkv_params = prep_linear_params(
            jnp.concatenate(kernel_ws[:3], axis=1),   # [D, 3D]
            jnp.concatenate(kernel_bs[:3]))           # [3D]

    def __call__(self, inputs, mask=None):
        query, key_, value = inputs
        B, Sq, D = query.shape
        Sk = key_.shape[1]
        self_attn = (query is key_) and (key_ is value)

        if self_attn:
            # Fused QKV projection: one pallas_call, activation read from HBM once.
            qkv = pallas_linear(query.reshape(B * Sq, D), self.qkv_params,
                                out_dtype=jnp.bfloat16).reshape(B, Sq, 3 * D)
        else:
            q = pallas_linear(query.reshape(B * Sq, D), self.lin_params[0],
                              out_dtype=jnp.bfloat16).reshape(B, Sq, D)
            k = pallas_linear(key_.reshape(B * Sk, D), self.lin_params[1],
                              out_dtype=jnp.bfloat16).reshape(B, Sk, D)
            v = pallas_linear(value.reshape(B * Sk, D), self.lin_params[2],
                              out_dtype=jnp.bfloat16).reshape(B, Sk, D)

        mask_i8 = None
        if mask is not None:
            # torch: mask.unsqueeze(1) broadcasts over heads; heads handled in-kernel.
            # TODO(synk): structured (e.g. causal) masks could be generated in-kernel
            # from broadcasted_iota instead of streaming an int8 [B,Sq,Sk] tensor.
            mask_i8 = jnp.broadcast_to(mask != 0, (B, Sq, Sk)).astype(jnp.int8)

        if self_attn and D % 128 == 0:
            # Attention reads the fused [B,S,3D] buffer directly (no HBM slices).
            x = pallas_attention_fused(qkv, mask_i8, self.h, self.d_k, D)
        else:
            if self_attn:
                q, k, v = qkv[..., :D], qkv[..., D:2 * D], qkv[..., 2 * D:]
            x = pallas_attention(q, k, v, mask_i8, self.h, self.d_k)   # [B,Sq,D] bf16

        out = pallas_linear(x.reshape(B * Sq, D), self.lin_params[3],
                            out_dtype=jnp.float32)
        return out.reshape(B, Sq, D)


# Plain-JAX reference (numerical sanity check only)
def reference_mha(mha, inputs, mask=None):
    q, k, v = inputs
    B, Sq, D = q.shape

    def lin(x, w, b):
        return x @ w + b

    def split(x):
        return x.reshape(B, -1, mha.h, mha.d_k).transpose(0, 2, 1, 3)

    qh = split(lin(q, mha.weights[0], mha.biases[0]))
    kh = split(lin(k, mha.weights[1], mha.biases[1]))
    vh = split(lin(v, mha.weights[2], mha.biases[2]))
    scores = jnp.einsum('bhqd,bhkd->bhqk', qh, kh) / math.sqrt(mha.d_k)
    if mask is not None:
        scores = jnp.where(mask[:, None, :, :] == 0, -1e9, scores)
    p = jax.nn.softmax(scores, axis=-1)
    x = jnp.einsum('bhqk,bhkd->bhqd', p, vh)
    x = x.transpose(0, 2, 1, 3).reshape(B, Sq, D)
    return lin(x, mha.weights[3], mha.biases[3])


if __name__ == "__main__":
    root = jax.random.PRNGKey(0)
    kx, kkv, kp, kx2, kp2 = jax.random.split(root, 5)
    B, S, Skv, d_model, h = 2, 8, 16, 32, 4

    mha = MultiHeadedAttentionPallas(h, d_model, kp)

    # 1) Self-attention with a causal mask (fused-QKV projection, d_model%128 != 0).
    x_self = jax.random.normal(kx, (B, S, d_model), jnp.float32)
    causal = jnp.broadcast_to(jnp.tril(jnp.ones((S, S), jnp.float32)), (B, S, S))
    out1 = jax.block_until_ready(mha((x_self, x_self, x_self), mask=causal))
    ref1 = reference_mha(mha, (x_self, x_self, x_self), mask=causal)
    assert out1.shape == (B, S, d_model)
    err1 = float(jnp.max(jnp.abs(out1 - ref1)))
    assert jnp.allclose(out1, ref1, atol=5e-2, rtol=5e-2), f"self-attn mismatch {err1}"

    # 2) Cross-attention, no mask (separate projections + kv-padding path).
    kv_in = jax.random.normal(kkv, (B, Skv, d_model), jnp.float32)
    out2 = jax.block_until_ready(mha((x_self, kv_in, kv_in), mask=None))
    ref2 = reference_mha(mha, (x_self, kv_in, kv_in), mask=None)
    assert out2.shape == (B, S, d_model)
    err2 = float(jnp.max(jnp.abs(out2 - ref2)))
    assert jnp.allclose(out2, ref2, atol=5e-2, rtol=5e-2), f"cross-attn mismatch {err2}"

    # 3) d_model=128: fused QKV buffer consumed DIRECTLY by the attention kernel.
    d_model2, h2 = 128, 8
    mha2 = MultiHeadedAttentionPallas(h2, d_model2, kp2)
    x_big = jax.random.normal(kx2, (B, S, d_model2), jnp.float32)
    out3 = jax.block_until_ready(mha2((x_big, x_big, x_big), mask=causal))
    ref3 = reference_mha(mha2, (x_big, x_big, x_big), mask=causal)
    assert out3.shape == (B, S, d_model2)
    err3 = float(jnp.max(jnp.abs(out3 - ref3)))
    assert jnp.allclose(out3, ref3, atol=5e-2, rtol=5e-2), f"fused-attn mismatch {err3}"

    print("KERNEL_OK")
</pallas_src>

<mosaic_0001>
module attributes {stable_mosaic.version = 11 : i64} {
  func.func @_linear_kernel(%arg0: i32, %arg1: i32, %arg2: i32, %arg3: memref<16x128xbf16, #tpu.memory_space<vmem>>, %arg4: memref<128x128xbf16, #tpu.memory_space<vmem>>, %arg5: memref<1x128xf32, #tpu.memory_space<vmem>>, %arg6: memref<16x128xbf16, #tpu.memory_space<vmem>>, %arg7: memref<16x128xf32, #tpu.memory_space<vmem>>) attributes {dimension_semantics = [#tpu.dimension_semantics<parallel>, #tpu.dimension_semantics<parallel>, #tpu.dimension_semantics<arbitrary>], iteration_bounds = array<i64: 1, 1, 1>, scalar_prefetch = 0 : i64, scratch_operands = 1 : i64, tpu.core_type = #tpu.core_type<tc>, window_params = [{transform_indices = @transform_0, window_bounds = array<i64: 16, 128>}, {transform_indices = @transform_1, window_bounds = array<i64: 128, 128>}, {transform_indices = @transform_2, window_bounds = array<i64: 1, 128>}, {transform_indices = @transform_3, window_bounds = array<i64: 16, 128>}]} {
    %c0_i32 = arith.constant 0 : i32
    %0 = arith.cmpi eq, %arg2, %c0_i32 : i32
    %1 = arith.extui %0 : i1 to i32
    %c0_i32_0 = arith.constant 0 : i32
    %2 = arith.cmpi ne, %1, %c0_i32_0 : i32
    scf.if %2 {
      %cst_10 = arith.constant 0.000000e+00 : f32
      %12 = vector.broadcast %cst_10 : f32 to vector<16x128xf32>
      %c0_11 = arith.constant 0 : index
      %c0_12 = arith.constant 0 : index
      %13 = vector.load %arg7[%c0_11, %c0_12] : memref<16x128xf32, #tpu.memory_space<vmem>>, vector<16x128xf32>
      tpu.vector_store %arg7[%c0_11, %c0_12], %12 {strides = array<i32>} : memref<16x128xf32, #tpu.memory_space<vmem>>, vector<16x128xf32>,
    } else {
    }
    %c0 = arith.constant 0 : index
    %c0_1 = arith.constant 0 : index
    %3 = vector.load %arg7[%c0, %c0_1] : memref<16x128xf32, #tpu.memory_space<vmem>>, vector<16x128xf32>
    %c0_2 = arith.constant 0 : index
    %c0_3 = arith.constant 0 : index
    %4 = vector.load %arg3[%c0_2, %c0_3] : memref<16x128xbf16, #tpu.memory_space<vmem>>, vector<16x128xbf16>
    %c0_4 = arith.constant 0 : index
    %c0_5 = arith.constant 0 : index
    %5 = vector.load %arg4[%c0_4, %c0_5] : memref<128x128xbf16, #tpu.memory_space<vmem>>, vector<128x128xbf16>
    %cst = arith.constant dense<0.000000e+00> : vector<16x128xf32>
    %6 = tpu.matmul %4, %5, %cst {dimension_numbers = #tpu.dot_dimension_numbers<[1], [0], [0], [1], [0, 0, 1, 1], [], []>} : vector<16x128xbf16>, vector<128x128xbf16>, vector<16x128xf32> -> vector<16x128xf32>
    %7 = arith.addf %3, %6 : vector<16x128xf32>
    %c0_6 = arith.constant 0 : index
    %c0_7 = arith.constant 0 : index
    %8 = vector.load %arg7[%c0_6, %c0_7] : memref<16x128xf32, #tpu.memory_space<vmem>>, vector<16x128xf32>
    tpu.vector_store %arg7[%c0_6, %c0_7], %7 {strides = array<i32>} : memref<16x128xf32, #tpu.memory_space<vmem>>, vector<16x128xf32>,
    %c0_i32_8 = arith.constant 0 : i32
    %9 = arith.cmpi eq, %arg2, %c0_i32_8 : i32
    %10 = arith.extui %9 : i1 to i32
    %c0_i32_9 = arith.constant 0 : i32
    %11 = arith.cmpi ne, %10, %c0_i32_9 : i32
    scf.if %11 {
      %c0_10 = arith.constant 0 : index
      %c0_11 = arith.constant 0 : index
      %12 = vector.load %arg7[%c0_10, %c0_11] : memref<16x128xf32, #tpu.memory_space<vmem>>, vector<16x128xf32>
      %c0_12 = arith.constant 0 : index
      %c0_13 = arith.constant 0 : index
      %13 = vector.load %arg5[%c0_12, %c0_13] : memref<1x128xf32, #tpu.memory_space<vmem>>, vector<1x128xf32>
      %14 = vector.broadcast %13 : vector<1x128xf32> to vector<16x128xf32>
      %15 = arith.addf %12, %14 : vector<16x128xf32>
      %16 = arith.truncf %15 : vector<16x128xf32> to vector<16x128xbf16>
      %c0_14 = arith.constant 0 : index
      %c0_15 = arith.constant 0 : index
      %17 = vector.load %arg6[%c0_14, %c0_15] : memref<16x128xbf16, #tpu.memory_space<vmem>>, vector<16x128xbf16>
      tpu.vector_store %arg6[%c0_14, %c0_15], %16 {strides = array<i32>} : memref<16x128xbf16, #tpu.memory_space<vmem>>, vector<16x128xbf16>,
    } else {
    }
    return
  }
  func.func @transform_0(%arg0: i32, %arg1: i32, %arg2: i32) -> (i32, i32) {
    %c0_i32 = arith.constant 0 : i32
    return %arg0, %arg2 : i32, i32
  }
  func.func @transform_1(%arg0: i32, %arg1: i32, %arg2: i32) -> (i32, i32) {
    %c0_i32 = arith.constant 0 : i32
    return %arg2, %arg1 : i32, i32
  }
  func.func @transform_2(%arg0: i32, %arg1: i32, %arg2: i32) -> (i32, i32) {
    %c0_i32 = arith.constant 0 : i32
    %c0_i32_0 = arith.constant 0 : i32
    return %c0_i32, %arg1 : i32, i32
  }
  func.func @transform_3(%arg0: i32, %arg1: i32, %arg2: i32) -> (i32, i32) {
    %c0_i32 = arith.constant 0 : i32
    return %arg0, %arg1 : i32, i32
  }
}

</mosaic_0001>

<bundles_post_ra>
// kernel: tpu_custom_call.1
= control target key start
LH: loop header
LB: loop body
LE: loop exit
PB: predicated region body
PF: predicated region fallthrough
CT: control target
= control target key end

     0   :  { %8 = vsyncpa [#allocation4], 0  ;;  %s422_s0 = inlined_call_operand.hbm [shape: bf16[16,128], index: 0, kind: input, shape index: {}]   ;;  %s423_s1 = inlined_call_operand.hbm [shape: bf16[128,128], index: 1, kind: input, shape index: {}]   ;;  %s424_s2 = inlined_call_operand.vmem [shape: f32[1,128], index: 2, kind: input, shape index: {}]   ;;  %s425_s3 = inlined_call_operand.hbm [shape: bf16[16,128], index: 3, kind: output, shape index: {}]  }
   0x1   :  { %9 = vsyncpa [#allocation7], 0 }
   0x2   :  { %10 = vsyncpa [#allocation5], 0  ;;  %s347_s12 = smov [#allocation3]   ;;  %s275_s16 = scalar_lea.hbm %s422_s0, 128 }
   0x3   :  { %s16_s13 = sshll.u32 %s347_s12, 4  ;;  %p276_p0 = scmp.ne.s32.totalorder %s422_s0, %s275_s16  ;;  %s17_s13 = int_to_ptr.vmem [resolvable:$true] %s16_s13 }
   0x4   :  { %p279_p1 = scmp.lt.u32.totalorder %s275_s16, %s422_s0 }
   0x6   :  { %p281_p2 = pnand %p279_p1, %p276_p0 }
   0x8   :  { %284 = shalt.err (!%p281_p2)
}
   0x9   :  { %s285_s21 = scalar_lea.vmem %s17_s13, 128  ;;  %p290_p4 = scmp.lt.s32.totalorder %s17_s13, %s17_s13 }
   0xa   :  { %p286_p3 = scmp.ne.s32.totalorder %s17_s13, %s285_s21  ;;  %p291_p5 = scmp.lt.s32.totalorder %s285_s21, %s285_s21 }
   0xc   :  { %p292_p6 = por %p291_p5, %p290_p4 }
   0xe   :  { %p293_p7 = pnand %p292_p6, %p286_p3 }
  0x10   :  { %296 = shalt.err (!%p293_p7)
}
  0x11   :  { %s348_s22 = smov 64   ;;  %s349_s23 = smov 4  }
  0x12   :  { %22 = dma.hbm_to_vmem [thread:$0]  %s422_s0, 128, %s17_s13, [#allocation4], %s348_s22, %s348_s22, %s349_s23  }
  0x13   :  { %s350_s26 = smov [#allocation6]   ;;  %s297_s30 = scalar_lea.hbm %s423_s1, 1024 }
  0x14   :  { %s28_s27 = sshll.u32 %s350_s26, 4  ;;  %p298_p8 = scmp.ne.s32.totalorder %s423_s1, %s297_s30  ;;  %s29_s27 = int_to_ptr.vmem [resolvable:$true] %s28_s27 }
  0x15   :  { %p301_p9 = scmp.lt.u32.totalorder %s297_s30, %s423_s1 }
  0x17   :  { %p303_p10 = pnand %p301_p9, %p298_p8 }
  0x19   :  { %306 = shalt.err (!%p303_p10)
}
  0x1a   :  { %s307_s8 = scalar_lea.vmem %s29_s27, 1024  ;;  %p312_p12 = scmp.lt.s32.totalorder %s29_s27, %s29_s27 }
  0x1b   :  { %p308_p11 = scmp.ne.s32.totalorder %s29_s27, %s307_s8  ;;  %p313_p13 = scmp.lt.s32.totalorder %s307_s8, %s307_s8 }
  0x1d   :  { %p314_p0 = por %p313_p13, %p312_p12 }
  0x1f   :  { %p315_p1 = pnand %p314_p0, %p308_p11 }
  0x21   :  { %318 = shalt.err (!%p315_p1)
}
  0x22   :  { %34 = dma.hbm_to_vmem [thread:$0]  %s423_s1, 1024, %s29_s27, [#allocation7], %s348_s22, %s348_s22, %s349_s23  }
  0x23   :  { %341 = dma.done.wait [#allocation4], 128  }
  0x24   :  { %342 = vsyncadd [#allocation4], 4294967168 }
  0x25   :  { %343 = dma.done.wait [#allocation7], 1024  }
  0x26   :  { %344 = vsyncadd [#allocation7], 4294966272  ;;  %v351_v0 = vmov 0.0   ;;  %vm352_vm0 = vmmov 0   ;;  %v266_v1 = vld [vmem:[#allocation6] sm:$0xff]   ;;  %v267_v2 = vld [vmem:[#allocation6 + $0x8] sm:$0xff]  }
  0x27   :  { %239 = vmatprep.subr.bf16.mxu0 %v351_v0  ;;  %255 = vmatprep.mubr.msk.bf16.mxu0 %vm352_vm0, %v351_v0  ;;  %v268_v3 = vld [vmem:[#allocation6 + $0x10] sm:$0xff]   ;;  %v269_v4 = vld [vmem:[#allocation6 + $0x18] sm:$0xff]   ;;  %v270_v5 = vld [vmem:[#allocation6 + $0x20] sm:$0xff]   ;;  %s353_s11 = smov [#allocation8]  }
  0x28   :  { %240 = vmatpush3.bf16.msra.mxu0 %v266_v1  ;;  %v271_v6 = vld [vmem:[#allocation6 + $0x28] sm:$0xff]   ;;  %v272_v7 = vld [vmem:[#allocation6 + $0x30] sm:$0xff]   ;;  %v273_v8 = vld [vmem:[#allocation6 + $0x38] sm:$0xff]   ;;  %s198_s12 = sshll.u32 %s353_s11, 4  ;;  %s199_s12 = int_to_ptr.vmem [resolvable:$true] %s198_s12 }
  0x29   :  { %241 = vmatprep.subr.bf16.mxu0 %v351_v0  ;;  %v274_v9 = vld [vmem:[#allocation3] sm:$0xff]   ;;  %s319_s13 = scalar_lea.vmem %s199_s12, 128  ;;  %p324_p3 = scmp.lt.s32.totalorder %s199_s12, %s199_s12 }
  0x2a   :  { %v220_v11 = vld [vmem:[%s424_s2] ss:$0 sm:$0xff]  ;;  %p320_p2 = scmp.ne.s32.totalorder %s199_s12, %s319_s13  ;;  %p325_p4 = scmp.lt.s32.totalorder %s319_s13, %s319_s13 }
  0x2c   :  { %242 = vmatpush3.bf16.msra.mxu0 %v267_v2  ;;  %p326_p5 = por %p325_p4, %p324_p3 }
  0x2d   :  { %243 = vmatprep.subr.bf16.mxu0 %v351_v0 }
  0x2e   :  { %p327_p6 = pnand %p326_p5, %p320_p2 }
  0x30   :  { %244 = vmatpush3.bf16.msra.mxu0 %v268_v3 }
  0x31   :  { %245 = vmatprep.subr.bf16.mxu0 %v351_v0 }
  0x34   :  { %246 = vmatpush3.bf16.msra.mxu0 %v269_v4 }
  0x35   :  { %247 = vmatprep.subr.bf16.mxu0 %v351_v0 }
  0x38   :  { %248 = vmatpush3.bf16.msra.mxu0 %v270_v5 }
  0x39   :  { %249 = vmatprep.subr.bf16.mxu0 %v351_v0 }
  0x3c   :  { %250 = vmatpush3.bf16.msra.mxu0 %v271_v6 }
  0x3d   :  { %251 = vmatprep.subr.bf16.mxu0 %v351_v0 }
  0x40   :  { %252 = vmatpush3.bf16.msra.mxu0 %v272_v7 }
  0x41   :  { %253 = vmatprep.subr.bf16.mxu0 %v351_v0 }
  0x44   :  { %254 = vmatpush3.bf16.msra.mxu0 %v273_v8 }
  0x47   :  { %256 = vmatmul.mubr.bf16.vlgmr.msra.gmra.mrb[0].mxu0 %v274_v9 }
 0x11a   :  { %v158_v10 = vpop.f32.mrb[0].mxu0 }
 0x11b   :  { %v257_v12 = vpop.f32.mrb[1].mxu0  ;;  %v181_v14 = vadd.f32 %v220_v11, %v158_v10 }
 0x11c   :  { %v161_v13 = vpop.f32.mrb[2].mxu0 }
 0x11d   :  { %v182_v15 = vadd.f32 %v220_v11, %v161_v13  ;;  %v258_v16 = vpop.f32.mrb[3].mxu0 }
 0x11f   :  { %v228_v17 = vpack.c.bf16 %v182_v15, %v181_v14 }
 0x121   :  { %229 = vst [vmem:[#allocation8] sm:$0xff] %v228_v17  }
 0x122   :  { %330 = shalt.err (!%p327_p6)
}
 0x123   :  { %s331_s2 = scalar_lea.hbm %s425_s3, 128 }
 0x124   :  { %p332_p7 = scmp.ne.s32.totalorder %s425_s3, %s331_s2  ;;  %p335_p8 = scmp.lt.u32.totalorder %s331_s2, %s425_s3 }
 0x126   :  { %p337_p9 = pnand %p335_p8, %p332_p7 }
 0x128   :  { %340 = shalt.err (!%p337_p9)
}
 0x129   :  { %204 = dma.vmem_to_hbm [thread:$0]  %s199_s12, 128, %s425_s3, [#allocation5], %s348_s22, %s348_s22, %s349_s23  }
 0x12a   :  { %345 = dma.done.wait [#allocation5], 128  }
 0x12b   :  { %346 = vsyncadd [#allocation5], 4294967168 }
 0x12c   :  { %208 = vsyncpa [#allocation4], 1 }
 0x12d   :  { %209 = vsyncpa [#allocation7], 1 }
 0x12e   :  { %210 = vsyncpa [#allocation5], 1 }

</bundles_post_ra>
